<compile_context>
chip_gen: v6e
topology: v6e:2x2x1
jax: 0.10.0
libtpu: 0.0.40
codegen_flags: <defaults>
</compile_context>

<pallas_src>
import jax
import jax.numpy as jnp
import numpy as np
from jax.experimental import pallas as pl
from jax.experimental.pallas import tpu as pltpu


# ----------------------------------------------------------------------------
# Optimal path: the module's forward is the identity — no kernel, no HBM traffic.
# ----------------------------------------------------------------------------
def dummy_transformer_block(x: jax.Array) -> jax.Array:
    """DummyTransformerBlock.forward(x) == x. Best implementation: return x."""
    return x


# ----------------------------------------------------------------------------
# Pallas path: explicit on-device identity copy (only if a copy must exist).
# ----------------------------------------------------------------------------
def _identity_copy_kernel(x_ref, o_ref):
    # Pure pass-through of the current (tile_rows, lane) block.
    o_ref[...] = x_ref[...]


def _sublane_pack(dtype) -> int:
    # Native sublane packing: 32-bit -> 8, 16-bit -> 16, 8-bit -> 32.
    return max(8, 32 // jnp.dtype(dtype).itemsize)


def _pick_lane(n: int):
    """Largest lane width (multiple of 128, <= 2048) that exactly divides n."""
    lane = (min(n, 2048) // 128) * 128
    while lane >= 128:
        if n % lane == 0:
            return lane
        lane -= 128
    return None


def _block_bytes_for_device():
    """Per-generation (block_bytes, vmem_limit_bytes) — trace-time Python ints."""
    kind = ""
    try:
        kind = jax.devices()[0].device_kind.lower()
    except Exception:
        pass
    if "v7" in kind or "7x" in kind:
        block_bytes = 8 * 1024 * 1024   # 3.2 TB/s HBM: amortize 0.35us/step overhead
    elif "v6" in kind:
        block_bytes = 4 * 1024 * 1024
    else:                               # v5e / unknown: stay inside 16 MiB scoped VMEM
        block_bytes = 2 * 1024 * 1024
    # 2x(in) + 2x(out) pipelined buffers + headroom; <= 40 MiB, under v7x's 64 MiB.
    vmem_limit = 4 * block_bytes + 8 * 1024 * 1024
    return block_bytes, vmem_limit


def _pick_tile_rows(rows: int, lane: int, itemsize: int, pack: int, block_bytes: int) -> int:
    if rows <= pack:
        return rows  # block dim == full array dim is always legal
    row_bytes = lane * itemsize
    target = max(pack, (block_bytes // row_bytes) // pack * pack)
    # Keep >= 4 grid steps (>= 2 for small inputs) so both v7x TensorCores engage.
    if rows >= 4 * pack:
        cap = max(pack, (rows // 4) // pack * pack)
    else:
        cap = max(pack, (rows // 2) // pack * pack)
    target = min(target, cap)
    # Prefer an exact divisor of rows: no padded/masked last block while the
    # output is aliased onto the donated input buffer.
    t = target
    while t >= pack:
        if rows % t == 0:
            return t
        t -= pack
    return target


def _pallas_identity(x: jax.Array) -> jax.Array:
    orig_shape = x.shape
    n = x.size
    dtype = x.dtype
    itemsize = jnp.dtype(dtype).itemsize
    pack = _sublane_pack(dtype)

    lane = _pick_lane(n)
    if lane is None:
        # TODO(synk): element count not divisible by 128 — fall back to the
        # trailing dim as the lane (may emit masked stores); padding the slab
        # would add copies outside the kernel and cost more than it saves.
        lane = orig_shape[-1]
    rows = n // lane
    xr = x.reshape(rows, lane)  # row-major, value-preserving view

    block_bytes, vmem_limit = _block_bytes_for_device()
    tile_rows = _pick_tile_rows(rows, lane, itemsize, pack, block_bytes)
    grid = (pl.cdiv(rows, tile_rows),)

    out = pl.pallas_call(
        _identity_copy_kernel,
        out_shape=jax.ShapeDtypeStruct((rows, lane), dtype),
        grid=grid,
        in_specs=[pl.BlockSpec((tile_rows, lane), lambda i: (i, 0))],
        out_specs=pl.BlockSpec((tile_rows, lane), lambda i: (i, 0)),
        # With donate_argnums=0 on the jit wrapper, this genuinely reuses the
        # input HBM buffer (no defensive copy, no fresh output allocation).
        input_output_aliases={0: 0},
        compiler_params=pltpu.CompilerParams(
            dimension_semantics=("parallel",),
            vmem_limit_bytes=vmem_limit,
        ),
    )(xr)
    return out.reshape(orig_shape)


# Donation makes input_output_aliases effective (caller gives up ownership of x).
dummy_transformer_block_pallas = jax.jit(_pallas_identity, donate_argnums=0)


if __name__ == "__main__":
    # Transformer-block-shaped input: batch=2, seq=8, emb_dim=32.
    key = jax.random.PRNGKey(0)
    x = jax.random.normal(key, (2, 8, 32), dtype=jnp.float32)
    x_host = np.asarray(x)  # host copy for the correctness checks

    # 1) Optimal identity path (no kernel at all).
    y_fast = dummy_transformer_block(x)
    assert y_fast.shape == x.shape and y_fast.dtype == x.dtype
    assert np.array_equal(np.asarray(y_fast), x_host)

    # 2) Pallas identity-copy path (donates its input, so give it a fresh buffer).
    x_dev = jnp.asarray(x_host)
    y = dummy_transformer_block_pallas(x_dev)
    y = jax.block_until_ready(y)
    assert y.shape == x.shape and y.dtype == x.dtype
    assert np.array_equal(np.asarray(y), x_host)

    print("KERNEL_OK")
</pallas_src>

<mosaic_0001>
module attributes {stable_mosaic.version = 11 : i64} {
  func.func @_identity_copy_kernel(%arg0: i32, %arg1: memref<1x512xf32, #tpu.memory_space<vmem>>, %arg2: memref<1x512xf32, #tpu.memory_space<vmem>>) attributes {dimension_semantics = [#tpu.dimension_semantics<parallel>], iteration_bounds = array<i64: 1>, scalar_prefetch = 0 : i64, scratch_operands = 0 : i64, tpu.core_type = #tpu.core_type<tc>, window_params = [{transform_indices = @transform_0, window_bounds = array<i64: 1, 512>}, {transform_indices = @transform_1, window_bounds = array<i64: 1, 512>}]} {
    %c0 = arith.constant 0 : index
    %c0_0 = arith.constant 0 : index
    %0 = vector.load %arg1[%c0, %c0_0] : memref<1x512xf32, #tpu.memory_space<vmem>>, vector<1x512xf32>
    %c0_1 = arith.constant 0 : index
    %c0_2 = arith.constant 0 : index
    %1 = vector.load %arg2[%c0_1, %c0_2] : memref<1x512xf32, #tpu.memory_space<vmem>>, vector<1x512xf32>
    tpu.vector_store %arg2[%c0_1, %c0_2], %0 {strides = array<i32>} : memref<1x512xf32, #tpu.memory_space<vmem>>, vector<1x512xf32>,
    return
  }
  func.func @transform_0(%arg0: i32) -> (i32, i32) {
    %c0_i32 = arith.constant 0 : i32
    %c0_i32_0 = arith.constant 0 : i32
    return %arg0, %c0_i32 : i32, i32
  }
  func.func @transform_1(%arg0: i32) -> (i32, i32) {
    %c0_i32 = arith.constant 0 : i32
    %c0_i32_0 = arith.constant 0 : i32
    return %arg0, %c0_i32 : i32, i32
  }
}

</mosaic_0001>

<bundles_post_ra>
// kernel: _pallas_identity.1
= control target key start
LH: loop header
LB: loop body
LE: loop exit
PB: predicated region body
PF: predicated region fallthrough
CT: control target
= control target key end

     0   :  { %v9_v0 = vlaneseq  ;;  %s34_s0 = inlined_call_operand.vmem [shape: f32[1,512], index: 0, kind: input, shape index: {}, may-alias: {0,1}]   ;;  %s35_s1 = inlined_call_operand.vmem [shape: f32[1,512], index: 1, kind: output, shape index: {}, may-alias: {0,1}]  }
   0x1   :  { %v8_v1 = vld [vmem:[%s34_s0] sm:$0xf] }
   0x2   :  { %vm11_vm0 = vcmp.lt.s32.totalorder %v9_v0, 512 }
   0x3   :  { %13 = vst.msk [vmem:[%s35_s1] sm:$0xf] %vm11_vm0, %v8_v1 }

</bundles_post_ra>
